<compile_context>
chip_gen: v7x
topology: tpu7x:2x2x1
jax: 0.10.0
libtpu: 0.0.40
codegen_flags: <defaults>
</compile_context>

<pallas_src>
import functools
import math

import jax
import jax.numpy as jnp
from jax.experimental import pallas as pl
from jax.experimental.pallas import tpu as pltpu

INPUT_SIZE = 128
H1 = 64
H2 = 16            # encoder output / "hidden_size"
OUT = 2            # number of actions
SLAB_W = 128       # lane-dense output slab width
ACTION_MAP = {0: 2, 1: 3}

# Packed parameter layout (rows of the single [PARAM_ROWS, 128] array):
#   [  0:128)  w1  (128 -> 64, zero-padded to 128 lanes)
#   [128:256)  w2  ( 64 -> 16, zero-padded rows/lanes)
#   [256:384)  wh  ( 16 -> fused actor|critic head, zero-padded rows)
#   row 384    b1  (64 lanes used)
#   row 385    b2  (16 lanes used)
#   row 386    bh  (fused head bias; actor/critic biases init to 0)
PARAM_ROWS = 387

# Output slab layout (lanes):
#   [0:OUT) = prob | OUT = v | OUT+1 = entropy | OUT+2 = sampled idx
#   OUT+3 = greedy idx | OUT+4 = log_prob(sampled idx)
_SLOT_V = OUT
_SLOT_ENT = OUT + 1
_SLOT_SAMPLE = OUT + 2
_SLOT_GREEDY = OUT + 3
_SLOT_ALOGP = OUT + 4


def _a3c_kernel(x_ref, p_ref, u_ref, out_ref):
    x = x_ref[...]                                   # [B, 128]
    u = u_ref[...]                                   # [B, 1] uniform in [0,1)

    w1 = p_ref[0:128, :]                             # [128, 128]
    w2 = p_ref[128:256, :]                           # [128, 128]
    wh = p_ref[256:384, :]                           # [128, 128]
    b1 = p_ref[384:385, :]                           # [1, 128]
    b2 = p_ref[385:386, :]                           # [1, 128]
    bh = p_ref[386:387, :]                           # [1, 128]

    # ----- encoder: Linear(128,64) -> ReLU -> Linear(64,16) -> ReLU -----
    # All operands are lane-dense 128-wide; padded lanes carry zeros.
    h1 = jnp.maximum(
        jnp.dot(x, w1, preferred_element_type=jnp.float32) + b1, 0.0)
    z = jnp.maximum(
        jnp.dot(h1, w2, preferred_element_type=jnp.float32) + b2, 0.0)

    # ----- fused actor + critic head (single matmul) -----
    # wh lanes [0,OUT) = actor weights, lane OUT = critic weight, rest zero.
    head = jnp.dot(z, wh, preferred_element_type=jnp.float32) + bh   # [B, 128]

    h0 = head[:, 0:1]                                # actor logit 0  [B,1]
    h1l = head[:, 1:2]                               # actor logit 1  [B,1]
    v = head[:, OUT:OUT + 1]                         # critic value   [B,1]

    # ----- OUT==2 specialized stable softmax / log-softmax (no XLU reduce) ---
    m = jnp.maximum(h0, h1l)
    e0 = jnp.exp(h0 - m)
    e1 = jnp.exp(h1l - m)
    s = e0 + e1
    inv_s = 1.0 / s                                  # exact reciprocal
    prob0 = e0 * inv_s
    prob1 = e1 * inv_s
    log_s = jnp.log(s)
    logp0 = h0 - m - log_s
    logp1 = h1l - m - log_s
    ent = -(logp0 * prob0 + logp1 * prob1)           # [B,1]

    # ----- categorical sample (inverse CDF) + greedy argmax -----
    take0 = u < prob0                                # sampled action == 0 ?
    sample_f = jnp.where(take0, 0.0, 1.0)            # [B,1]
    greedy_f = jnp.where(h0 >= h1l, 0.0, 1.0)        # torch .max keeps first on ties
    alogp = jnp.where(take0, logp0, logp1)           # log_prob.gather(1, sample)

    # ----- pack everything into one lane-dense slab, single unmasked store ---
    B = x.shape[0]
    lane = jax.lax.broadcasted_iota(jnp.int32, (B, SLAB_W), 1)
    slab = jnp.where(lane == 0, prob0, 0.0)
    slab = jnp.where(lane == 1, prob1, slab)
    slab = jnp.where(lane == _SLOT_V, v, slab)
    slab = jnp.where(lane == _SLOT_ENT, ent, slab)
    slab = jnp.where(lane == _SLOT_SAMPLE, sample_f, slab)
    slab = jnp.where(lane == _SLOT_GREEDY, greedy_f, slab)
    slab = jnp.where(lane == _SLOT_ALOGP, alogp, slab)
    out_ref[...] = slab


def a3c_forward_core(x, packed_params, u):
    """One Pallas launch. x:[B,128] f32, u:[B,1] f32 -> slab [B,128] f32."""
    B = x.shape[0]
    flops = 2 * B * SLAB_W * SLAB_W * 3              # three 128x128 matmuls
    bytes_accessed = 4 * (B * SLAB_W                 # x
                          + PARAM_ROWS * SLAB_W      # packed params
                          + B                        # uniforms
                          + B * SLAB_W)              # output slab
    return pl.pallas_call(
        _a3c_kernel,
        out_shape=jax.ShapeDtypeStruct((B, SLAB_W), jnp.float32),
        in_specs=[
            pl.BlockSpec(memory_space=pltpu.MemorySpace.VMEM),   # x
            pl.BlockSpec(memory_space=pltpu.MemorySpace.VMEM),   # packed params
            pl.BlockSpec(memory_space=pltpu.MemorySpace.VMEM),   # uniforms
        ],
        out_specs=pl.BlockSpec(memory_space=pltpu.MemorySpace.VMEM),
        cost_estimate=pl.CostEstimate(
            flops=flops, transcendentals=4 * B, bytes_accessed=bytes_accessed),
    )(x, packed_params, u)


def normalized_columns_initializer(key, shape, std=1.0):
    # matches the PyTorch helper: randn, then scale rows to norm `std`
    out = jax.random.normal(key, shape, dtype=jnp.float32)
    return out * (std / jnp.sqrt(jnp.sum(out * out, axis=1, keepdims=True)))


def init_params(key):
    """Deterministic init. Returns (packed [387,128] params, raw dict for ref)."""
    ks = jax.random.split(key, 6)

    def linear_init(kw, kb, fan_in, fan_out):
        bound = 1.0 / math.sqrt(fan_in)
        w = jax.random.uniform(kw, (fan_in, fan_out), jnp.float32, -bound, bound)
        b = jax.random.uniform(kb, (fan_out,), jnp.float32, -bound, bound)
        return w, b

    w1, b1 = linear_init(ks[0], ks[1], INPUT_SIZE, H1)      # [128,64], [64]
    w2, b2 = linear_init(ks[2], ks[3], H1, H2)              # [64,16],  [16]

    # fc_actor: normalized_columns_initializer(std=0.01), bias 0 (torch [out,in])
    wa = normalized_columns_initializer(ks[4], (OUT, H2), std=0.01).T   # [16, 2]
    # fc_critic: normalized_columns_initializer(std=1.0), bias 0
    wc = normalized_columns_initializer(ks[5], (1, H2), std=1.0).T      # [16, 1]

    P = jnp.zeros((PARAM_ROWS, SLAB_W), jnp.float32)
    P = P.at[0:INPUT_SIZE, 0:H1].set(w1)                    # w1 block
    P = P.at[128:128 + H1, 0:H2].set(w2)                    # w2 block
    P = P.at[256:256 + H2, 0:OUT].set(wa)                   # actor head
    P = P.at[256:256 + H2, OUT:OUT + 1].set(wc)             # critic head
    P = P.at[384, 0:H1].set(b1)
    P = P.at[385, 0:H2].set(b2)
    # row 386 = fused head bias: actor/critic biases are zero-initialized.

    raw = dict(w1=w1, b1=b1, w2=w2, b2=b2, wa=wa, wc=wc)
    return P, raw


@functools.partial(jax.jit, static_argnames=("training",))
def model_forward(x, packed_params, key, training=True):
    """Full Model.forward semantics, end-to-end on device (no host sync).

    The rollout loop must pass a fresh `key` every step so stochastic actions
    stay uncorrelated across calls.
    """
    B = x.shape[0]
    Bp = max(8, ((B + 7) // 8) * 8)                  # pad batch to f32 sublane
    xp = jnp.pad(x, ((0, Bp - B), (0, 0)))
    u = jax.random.uniform(key, (Bp, 1), dtype=jnp.float32)

    slab = a3c_forward_core(xp, packed_params, u)[:B]

    prob = slab[:, 0:OUT]
    v = slab[:, _SLOT_V:_SLOT_V + 1]
    entropy = slab[:, _SLOT_ENT:_SLOT_ENT + 1]
    action_log_prob = slab[:, _SLOT_ALOGP:_SLOT_ALOGP + 1]

    if training:
        idx = slab[:, _SLOT_SAMPLE].astype(jnp.int32)        # prob.multinomial(1)
    else:
        idx = slab[:, _SLOT_GREEDY].astype(jnp.int32)        # prob.max(1)[1]

    # action_map {0: 2, 1: 3} as an on-device lookup (no .item(), no dict).
    action_table = jnp.asarray([ACTION_MAP[0], ACTION_MAP[1]], dtype=jnp.int32)
    action = jnp.take(action_table, idx)                     # [B]

    aux = {}
    if training:
        aux = {"v": v, "entropy": entropy, "action_log_prob": action_log_prob}
    return action, prob, aux


def _ref_forward(x, raw):
    """Pure-JAX reference for correctness checking (no sampling)."""
    h1 = jax.nn.relu(x @ raw["w1"] + raw["b1"])
    z = jax.nn.relu(h1 @ raw["w2"] + raw["b2"])
    logit = z @ raw["wa"]                                    # actor bias == 0
    prob = jax.nn.softmax(logit, axis=1)
    logp = jax.nn.log_softmax(logit, axis=1)
    v = z @ raw["wc"]                                        # critic bias == 0
    ent = -jnp.sum(logp * prob, axis=1, keepdims=True)
    return prob, v, ent


# TODO(synk): nn.LSTMCell(32, 16) exists in the module but is never used in
# forward(), so it is intentionally not implemented here.

if __name__ == "__main__":
    key = jax.random.PRNGKey(0)
    pkey, xkey, xbkey, skey1, skey2 = jax.random.split(key, 5)

    packed_params, raw_params = init_params(pkey)

    # ---- single-observation path (matches the PyTorch module, batch=1) ----
    x = jax.random.normal(xkey, (1, INPUT_SIZE), dtype=jnp.float32)
    action, prob, aux = model_forward(x, packed_params, skey1, training=True)
    action, prob, aux = jax.block_until_ready((action, prob, aux))

    assert int(action[0]) in (2, 3)
    assert prob.shape == (1, OUT)
    assert aux["v"].shape == (1, 1)
    assert aux["entropy"].shape == (1, 1)
    assert aux["action_log_prob"].shape == (1, 1)
    assert abs(float(jnp.sum(prob)) - 1.0) < 1e-4

    # numerical check against the pure-JAX reference
    ref_prob, ref_v, ref_ent = _ref_forward(x, raw_params)
    assert bool(jnp.allclose(prob, ref_prob, atol=1e-5))
    assert bool(jnp.allclose(aux["v"], ref_v, atol=1e-4))
    assert bool(jnp.allclose(aux["entropy"], ref_ent, atol=1e-4))

    # ---- batched throughput path (padded-to-8 sublanes, same kernel) ----
    xb = jax.random.normal(xbkey, (8, INPUT_SIZE), dtype=jnp.float32)
    actions_b, prob_b, aux_b = model_forward(xb, packed_params, skey2,
                                             training=True)
    jax.block_until_ready((actions_b, prob_b, aux_b))
    assert actions_b.shape == (8,)
    assert bool(jnp.all((actions_b == 2) | (actions_b == 3)))
    assert bool(jnp.allclose(jnp.sum(prob_b, axis=1), 1.0, atol=1e-4))

    # ---- eval path (greedy argmax) ----
    action_eval, prob_eval, aux_eval = model_forward(x, packed_params, skey1,
                                                     training=False)
    jax.block_until_ready((action_eval, prob_eval))
    assert int(action_eval[0]) in (2, 3)
    greedy_ref = int(jnp.argmax(ref_prob[0]))
    assert int(action_eval[0]) == ACTION_MAP[greedy_ref]
    assert aux_eval == {}

    print("KERNEL_OK")
</pallas_src>

<mosaic_0001>
module attributes {stable_mosaic.version = 11 : i64} {
  func.func @_a3c_kernel(%arg0: memref<8x128xf32, #tpu.memory_space<vmem>>, %arg1: memref<387x128xf32, #tpu.memory_space<vmem>>, %arg2: memref<8x1xf32, #tpu.memory_space<vmem>>, %arg3: memref<8x128xf32, #tpu.memory_space<vmem>>) attributes {dimension_semantics = [], scalar_prefetch = 0 : i64, scratch_operands = 0 : i64, tpu.core_type = #tpu.core_type<tc>} {
    %c0 = arith.constant 0 : index
    %c0_0 = arith.constant 0 : index
    %0 = vector.load %arg0[%c0, %c0_0] : memref<8x128xf32, #tpu.memory_space<vmem>>, vector<8x128xf32>
    %c0_1 = arith.constant 0 : index
    %c0_2 = arith.constant 0 : index
    %1 = vector.load %arg2[%c0_1, %c0_2] : memref<8x1xf32, #tpu.memory_space<vmem>>, vector<8x1xf32>
    %c0_3 = arith.constant 0 : index
    %c0_4 = arith.constant 0 : index
    %2 = vector.load %arg1[%c0_3, %c0_4] : memref<387x128xf32, #tpu.memory_space<vmem>>, vector<128x128xf32>
    %c128 = arith.constant 128 : index
    %c0_5 = arith.constant 0 : index
    %3 = vector.load %arg1[%c128, %c0_5] : memref<387x128xf32, #tpu.memory_space<vmem>>, vector<128x128xf32>
    %c256 = arith.constant 256 : index
    %c0_6 = arith.constant 0 : index
    %4 = vector.load %arg1[%c256, %c0_6] : memref<387x128xf32, #tpu.memory_space<vmem>>, vector<128x128xf32>
    %c384 = arith.constant 384 : index
    %c0_7 = arith.constant 0 : index
    %5 = vector.load %arg1[%c384, %c0_7] : memref<387x128xf32, #tpu.memory_space<vmem>>, vector<1x128xf32>
    %c385 = arith.constant 385 : index
    %c0_8 = arith.constant 0 : index
    %6 = vector.load %arg1[%c385, %c0_8] : memref<387x128xf32, #tpu.memory_space<vmem>>, vector<1x128xf32>
    %c386 = arith.constant 386 : index
    %c0_9 = arith.constant 0 : index
    %7 = vector.load %arg1[%c386, %c0_9] : memref<387x128xf32, #tpu.memory_space<vmem>>, vector<1x128xf32>
    %cst = arith.constant dense<0.000000e+00> : vector<8x128xf32>
    %8 = tpu.matmul %0, %2, %cst {dimension_numbers = #tpu.dot_dimension_numbers<[1], [0], [0], [1], [0, 0, 1, 1], [], []>} : vector<8x128xf32>, vector<128x128xf32>, vector<8x128xf32> -> vector<8x128xf32>
    %9 = vector.broadcast %5 : vector<1x128xf32> to vector<8x128xf32>
    %10 = arith.addf %8, %9 : vector<8x128xf32>
    %cst_10 = arith.constant 0.000000e+00 : f32
    %11 = vector.broadcast %cst_10 : f32 to vector<8x128xf32>
    %12 = arith.maximumf %10, %11 : vector<8x128xf32>
    %cst_11 = arith.constant dense<0.000000e+00> : vector<8x128xf32>
    %13 = tpu.matmul %12, %3, %cst_11 {dimension_numbers = #tpu.dot_dimension_numbers<[1], [0], [0], [1], [0, 0, 1, 1], [], []>} : vector<8x128xf32>, vector<128x128xf32>, vector<8x128xf32> -> vector<8x128xf32>
    %14 = vector.broadcast %6 : vector<1x128xf32> to vector<8x128xf32>
    %15 = arith.addf %13, %14 : vector<8x128xf32>
    %cst_12 = arith.constant 0.000000e+00 : f32
    %16 = vector.broadcast %cst_12 : f32 to vector<8x128xf32>
    %17 = arith.maximumf %15, %16 : vector<8x128xf32>
    %cst_13 = arith.constant dense<0.000000e+00> : vector<8x128xf32>
    %18 = tpu.matmul %17, %4, %cst_13 {dimension_numbers = #tpu.dot_dimension_numbers<[1], [0], [0], [1], [0, 0, 1, 1], [], []>} : vector<8x128xf32>, vector<128x128xf32>, vector<8x128xf32> -> vector<8x128xf32>
    %19 = vector.broadcast %7 : vector<1x128xf32> to vector<8x128xf32>
    %20 = arith.addf %18, %19 : vector<8x128xf32>
    %21 = vector.extract_strided_slice %20 {offsets = [0, 0], sizes = [8, 1], strides = [1, 1]} : vector<8x128xf32> to vector<8x1xf32>
    %22 = vector.extract_strided_slice %20 {offsets = [0, 1], sizes = [8, 1], strides = [1, 1]} : vector<8x128xf32> to vector<8x1xf32>
    %23 = vector.extract_strided_slice %20 {offsets = [0, 2], sizes = [8, 1], strides = [1, 1]} : vector<8x128xf32> to vector<8x1xf32>
    %24 = arith.maximumf %21, %22 : vector<8x1xf32>
    %25 = arith.subf %21, %24 : vector<8x1xf32>
    %26 = math.exp %25 : vector<8x1xf32>
    %27 = arith.subf %22, %24 : vector<8x1xf32>
    %28 = math.exp %27 : vector<8x1xf32>
    %29 = arith.addf %26, %28 : vector<8x1xf32>
    %cst_14 = arith.constant 1.000000e+00 : f32
    %30 = vector.broadcast %cst_14 : f32 to vector<8x1xf32>
    %31 = arith.divf %30, %29 : vector<8x1xf32>
    %32 = arith.mulf %26, %31 : vector<8x1xf32>
    %33 = arith.mulf %28, %31 : vector<8x1xf32>
    %34 = math.log %29 : vector<8x1xf32>
    %35 = arith.subf %21, %24 : vector<8x1xf32>
    %36 = arith.subf %35, %34 : vector<8x1xf32>
    %37 = arith.subf %22, %24 : vector<8x1xf32>
    %38 = arith.subf %37, %34 : vector<8x1xf32>
    %39 = arith.mulf %36, %32 : vector<8x1xf32>
    %40 = arith.mulf %38, %33 : vector<8x1xf32>
    %41 = arith.addf %39, %40 : vector<8x1xf32>
    %cst_15 = arith.constant 0.000000e+00 : f32
    %42 = vector.broadcast %cst_15 : f32 to vector<8x1xf32>
    %43 = arith.subf %42, %41 : vector<8x1xf32>
    %44 = arith.cmpf olt, %1, %32 : vector<8x1xf32>
    %cst_16 = arith.constant 0.000000e+00 : f32
    %cst_17 = arith.constant 1.000000e+00 : f32
    %45 = vector.broadcast %cst_16 : f32 to vector<8x1xf32>
    %46 = vector.broadcast %cst_17 : f32 to vector<8x1xf32>
    %47 = arith.select %44, %45, %46 : vector<8x1xi1>, vector<8x1xf32>
    %48 = arith.cmpf oge, %21, %22 : vector<8x1xf32>
    %cst_18 = arith.constant 0.000000e+00 : f32
    %cst_19 = arith.constant 1.000000e+00 : f32
    %49 = vector.broadcast %cst_18 : f32 to vector<8x1xf32>
    %50 = vector.broadcast %cst_19 : f32 to vector<8x1xf32>
    %51 = arith.select %48, %49, %50 : vector<8x1xi1>, vector<8x1xf32>
    %52 = arith.select %44, %36, %38 : vector<8x1xi1>, vector<8x1xf32>
    %53 = tpu.iota {dimensions = array<i32: 1>} : vector<8x128xi32>
    %c0_i32 = arith.constant 0 : i32
    %54 = vector.broadcast %c0_i32 : i32 to vector<8x128xi32>
    %55 = arith.cmpi eq, %53, %54 : vector<8x128xi32>
    %cst_20 = arith.constant 0.000000e+00 : f32
    %56 = vector.shape_cast %32 : vector<8x1xf32> to vector<8x1xf32>
    %57 = vector.broadcast %56 : vector<8x1xf32> to vector<8x128xf32>
    %58 = vector.broadcast %cst_20 : f32 to vector<8x128xf32>
    %59 = arith.select %55, %57, %58 : vector<8x128xi1>, vector<8x128xf32>
    %c1_i32 = arith.constant 1 : i32
    %60 = vector.broadcast %c1_i32 : i32 to vector<8x128xi32>
    %61 = arith.cmpi eq, %53, %60 : vector<8x128xi32>
    %62 = vector.shape_cast %33 : vector<8x1xf32> to vector<8x1xf32>
    %63 = vector.broadcast %62 : vector<8x1xf32> to vector<8x128xf32>
    %64 = arith.select %61, %63, %59 : vector<8x128xi1>, vector<8x128xf32>
    %c2_i32 = arith.constant 2 : i32
    %65 = vector.broadcast %c2_i32 : i32 to vector<8x128xi32>
    %66 = arith.cmpi eq, %53, %65 : vector<8x128xi32>
    %67 = vector.shape_cast %23 : vector<8x1xf32> to vector<8x1xf32>
    %68 = vector.broadcast %67 : vector<8x1xf32> to vector<8x128xf32>
    %69 = arith.select %66, %68, %64 : vector<8x128xi1>, vector<8x128xf32>
    %c3_i32 = arith.constant 3 : i32
    %70 = vector.broadcast %c3_i32 : i32 to vector<8x128xi32>
    %71 = arith.cmpi eq, %53, %70 : vector<8x128xi32>
    %72 = vector.shape_cast %43 : vector<8x1xf32> to vector<8x1xf32>
    %73 = vector.broadcast %72 : vector<8x1xf32> to vector<8x128xf32>
    %74 = arith.select %71, %73, %69 : vector<8x128xi1>, vector<8x128xf32>
    %c4_i32 = arith.constant 4 : i32
    %75 = vector.broadcast %c4_i32 : i32 to vector<8x128xi32>
    %76 = arith.cmpi eq, %53, %75 : vector<8x128xi32>
    %77 = vector.shape_cast %47 : vector<8x1xf32> to vector<8x1xf32>
    %78 = vector.broadcast %77 : vector<8x1xf32> to vector<8x128xf32>
    %79 = arith.select %76, %78, %74 : vector<8x128xi1>, vector<8x128xf32>
    %c5_i32 = arith.constant 5 : i32
    %80 = vector.broadcast %c5_i32 : i32 to vector<8x128xi32>
    %81 = arith.cmpi eq, %53, %80 : vector<8x128xi32>
    %82 = vector.shape_cast %51 : vector<8x1xf32> to vector<8x1xf32>
    %83 = vector.broadcast %82 : vector<8x1xf32> to vector<8x128xf32>
    %84 = arith.select %81, %83, %79 : vector<8x128xi1>, vector<8x128xf32>
    %c6_i32 = arith.constant 6 : i32
    %85 = vector.broadcast %c6_i32 : i32 to vector<8x128xi32>
    %86 = arith.cmpi eq, %53, %85 : vector<8x128xi32>
    %87 = vector.shape_cast %52 : vector<8x1xf32> to vector<8x1xf32>
    %88 = vector.broadcast %87 : vector<8x1xf32> to vector<8x128xf32>
    %89 = arith.select %86, %88, %84 : vector<8x128xi1>, vector<8x128xf32>
    %c0_21 = arith.constant 0 : index
    %c0_22 = arith.constant 0 : index
    %90 = vector.load %arg3[%c0_21, %c0_22] : memref<8x128xf32, #tpu.memory_space<vmem>>, vector<8x128xf32>
    tpu.vector_store %arg3[%c0_21, %c0_22], %89 {strides = array<i32>} : memref<8x128xf32, #tpu.memory_space<vmem>>, vector<8x128xf32>,
    return
  }
}

</mosaic_0001>

<bundles_post_ra>
// kernel: model_forward.1
= control target key start
LH: loop header
LB: loop body
LE: loop exit
PB: predicated region body
PF: predicated region fallthrough
CT: control target
= control target key end

     0   :  { %8 = vsyncpa [#allocation3], 0  ;;  %s699_s12 = smov [#allocation2]   ;;  %s788_s0 = inlined_call_operand.vmem [shape: f32[8,128], index: 0, kind: input, shape index: {}]   ;;  %s789_s1 = inlined_call_operand.hbm [shape: f32[387,128], index: 1, kind: input, shape index: {}]   ;;  %s790_s2 = inlined_call_operand.vmem [shape: f32[8,1], index: 2, kind: input, shape index: {}]   ;;  %s791_s3 = inlined_call_operand.vmem [shape: f32[8,128], index: 3, kind: output, shape index: {}]  }
   0x1   :  { %s16_s13 = sshll.u32 %s699_s12, 4  ;;  %s675_s16 = scalar_lea.hbm %s789_s1, 6272  ;;  %s17_s13 = int_to_ptr.vmem [resolvable:$true] %s16_s13 }
   0x2   :  { %p676_p0 = scmp.ne.s32.totalorder %s789_s1, %s675_s16  ;;  %p679_p1 = scmp.lt.u32.totalorder %s675_s16, %s789_s1 }
   0x4   :  { %p681_p2 = pnand %p679_p1, %p676_p0 }
   0x6   :  { %684 = shalt.err (!%p681_p2)
}
   0x7   :  { %s685_s21 = scalar_lea.vmem %s17_s13, 6272  ;;  %p690_p4 = scmp.lt.s32.totalorder %s17_s13, %s17_s13 }
   0x8   :  { %p686_p3 = scmp.ne.s32.totalorder %s17_s13, %s685_s21  ;;  %p691_p5 = scmp.lt.s32.totalorder %s685_s21, %s685_s21 }
   0xa   :  { %p692_p6 = por %p691_p5, %p690_p4 }
   0xc   :  { %p693_p7 = pnand %p692_p6, %p686_p3 }
   0xe   :  { %696 = shalt.err (!%p693_p7)
}
   0xf   :  { %s700_s22 = smov 128   ;;  %s701_s23 = smov 8  }
  0x10   :  { %22 = dma.hbm_to_vmem [thread:$0]  %s789_s1, 6272, %s17_s13, [#allocation3], %s700_s22, %s700_s22, %s701_s23  }
  0x11   :  { %697 = dma.done.wait [#allocation3], 6272  }
  0x12   :  { %698 = vsyncadd [#allocation3], 4294961024  ;;  %v702_v0 = vmov 0.0|0.0   ;;  %vm703_vm0 = vmmov 0   ;;  %v704_v1 = vmov 0.0   ;;  %v30_v2 = vld [vmem:[#allocation2] sm:$0xff] }
  0x13   :  { %573 = vmatprep.subr.bf16.mxu0 %v702_v0  ;;  %500 = vmatprep.mubr.msk.f32.mxu0 %vm703_vm0, %v704_v1  ;;  %v31_v3 = vld [vmem:[#allocation2 + $0x8] sm:$0xff]  ;;  %v32_v4 = vld [vmem:[#allocation2 + $0x10] sm:$0xff]  ;;  %v33_v6 = vld [vmem:[#allocation2 + $0x18] sm:$0xff]  ;;  %s706_s27 = smov 1  }
  0x14   :  { %597 = vmatprep.subr.bf16.mxu1 %v702_v0  ;;  %535 = vmatprep.mubr.msk.f32.mxu1 %vm703_vm0, %v704_v1  ;;  %v574_v5 = vpack.c.bf16 %v31_v3, %v30_v2  ;;  %v577_v7 = vpack.c.bf16 %v33_v6, %v32_v4  ;;  %v34_v8 = vld [vmem:[#allocation2 + $0x20] sm:$0xff]  ;;  %v35_v9 = vld [vmem:[#allocation2 + $0x28] sm:$0xff]  ;;  %v48_v12 = vld [vmem:[#allocation2 + $0x90] sm:$0xff] }
  0x15   :  { %v46_v10 = vld [vmem:[#allocation2 + $0x80] sm:$0xff]  ;;  %v47_v11 = vld [vmem:[#allocation2 + $0x88] sm:$0xff]  ;;  %v49_v13 = vld [vmem:[#allocation2 + $0x98] sm:$0xff]  ;;  %v580_v14 = vpack.c.bf16 %v35_v9, %v34_v8 }
  0x16   :  { %575 = vmatpush3.bf16.msra.mxu0 %v574_v5  ;;  %v598_v15 = vpack.c.bf16 %v47_v11, %v46_v10  ;;  %v36_v16 = vld [vmem:[#allocation2 + $0x30] sm:$0xff]  ;;  %v37_v17 = vld [vmem:[#allocation2 + $0x38] sm:$0xff]  ;;  %v601_v18 = vpack.c.bf16 %v49_v13, %v48_v12  ;;  %v50_v19 = vld [vmem:[#allocation2 + $0xa0] sm:$0xff] }
  0x17   :  { %576 = vmatprep.subr.bf16.mxu0 %v702_v0  ;;  %v51_v20 = vld [vmem:[#allocation2 + $0xa8] sm:$0xff]  ;;  %v583_v21 = vpack.c.bf16 %v37_v17, %v36_v16  ;;  %v38_v22 = vld [vmem:[#allocation2 + $0x40] sm:$0xff]  ;;  %v52_v25 = vld [vmem:[#allocation2 + $0xb0] sm:$0xff] }
  0x18   :  { %599 = vmatpush3.bf16.msra.mxu1 %v598_v15  ;;  %v39_v23 = vld [vmem:[#allocation2 + $0x48] sm:$0xff]  ;;  %v604_v24 = vpack.c.bf16 %v51_v20, %v50_v19  ;;  %v53_v26 = vld [vmem:[#allocation2 + $0xb8] sm:$0xff]  ;;  %v40_v28 = vld [vmem:[#allocation2 + $0x50] sm:$0xff] }
  0x19   :  { %600 = vmatprep.subr.bf16.mxu1 %v702_v0  ;;  %v586_v27 = vpack.c.bf16 %v39_v23, %v38_v22  ;;  %v41_v29 = vld [vmem:[#allocation2 + $0x58] sm:$0xff]  ;;  %v607_v30 = vpack.c.bf16 %v53_v26, %v52_v25  ;;  %v54_v31 = vld [vmem:[#allocation2 + $0xc0] sm:$0xff]  ;;  %v55_v32 = vld [vmem:[#allocation2 + $0xc8] sm:$0xff] }
  0x1a   :  { %578 = vmatpush3.bf16.msra.mxu0 %v577_v7  ;;  %v589_v33 = vpack.c.bf16 %v41_v29, %v40_v28  ;;  %v42_v34 = vld [vmem:[#allocation2 + $0x60] sm:$0xff]  ;;  %v43_v35 = vld [vmem:[#allocation2 + $0x68] sm:$0xff]  ;;  %v610_v36 = vpack.c.bf16 %v55_v32, %v54_v31  ;;  %v56_v37 = vld [vmem:[#allocation2 + $0xd0] sm:$0xff] }
  0x1b   :  { %579 = vmatprep.subr.bf16.mxu0 %v702_v0  ;;  %v57_v38 = vld [vmem:[#allocation2 + $0xd8] sm:$0xff]  ;;  %v592_v39 = vpack.c.bf16 %v43_v35, %v42_v34  ;;  %v44_v40 = vld [vmem:[#allocation2 + $0x70] sm:$0xff]  ;;  %v58_v43 = vld [vmem:[#allocation2 + $0xe0] sm:$0xff] }
  0x1c   :  { %602 = vmatpush3.bf16.msra.mxu1 %v601_v18  ;;  %v45_v41 = vld [vmem:[#allocation2 + $0x78] sm:$0xff]  ;;  %v613_v42 = vpack.c.bf16 %v57_v38, %v56_v37  ;;  %v59_v44 = vld [vmem:[#allocation2 + $0xe8] sm:$0xff]  ;;  %v28_v47 = vld [vmem:[%s788_s0] sm:$0xff]  ;;  %s705_s0 = smov 127   ;;  %v708_v37 = vmov 0  }
  0x1d   :  { %603 = vmatprep.subr.bf16.mxu1 %v702_v0  ;;  %v595_v45 = vpack.c.bf16 %v45_v41, %v44_v40  ;;  %v616_v46 = vpack.c.bf16 %v59_v44, %v58_v43  ;;  %v60_v48 = vld [vmem:[#allocation2 + $0xf0] sm:$0xff]  ;;  %v61_v49 = vld [vmem:[#allocation2 + $0xf8] sm:$0xff]  ;;  %v62_v51 = vld [vmem:[#allocation2 + $0x100] sm:$0xff]  ;;  %657 = vset.pattern.permute.xlu1 %v708_v37 }
  0x1e   :  { %581 = vmatpush3.bf16.msra.mxu0 %v580_v14  ;;  %v619_v50 = vpack.c.bf16 %v61_v49, %v60_v48  ;;  %v63_v52 = vld [vmem:[#allocation2 + $0x108] sm:$0xff]  ;;  %v64_v53 = vld [vmem:[#allocation2 + $0x110] sm:$0xff]  ;;  %v65_v55 = vld [vmem:[#allocation2 + $0x118] sm:$0xff]  ;;  %v709_v48 = vmov 1.0  }
  0x1f   :  { %582 = vmatprep.subr.bf16.mxu0 %v702_v0  ;;  %v622_v54 = vpack.c.bf16 %v63_v52, %v62_v51  ;;  %v625_v56 = vpack.c.bf16 %v65_v55, %v64_v53  ;;  %v66_v57 = vld [vmem:[#allocation2 + $0x120] sm:$0xff]  ;;  %v67_v58 = vld [vmem:[#allocation2 + $0x128] sm:$0xff]  ;;  %v68_v60 = vld [vmem:[#allocation2 + $0x130] sm:$0xff]  ;;  %v710_v52 = vmov 2  }
  0x20   :  { %605 = vmatpush3.bf16.msra.mxu1 %v604_v24  ;;  %v628_v59 = vpack.c.bf16 %v67_v58, %v66_v57  ;;  %v69_v61 = vld [vmem:[#allocation2 + $0x138] sm:$0xff]  ;;  %v70_v63 = vld [vmem:[#allocation2 + $0x140] sm:$0xff]  ;;  %v72_v3 = vld [vmem:[#allocation2 + $0x150] sm:$0xff] }
  0x21   :  { %606 = vmatprep.subr.bf16.mxu1 %v702_v0  ;;  %v631_v62 = vpack.c.bf16 %v69_v61, %v68_v60  ;;  %v73_v4 = vld [vmem:[#allocation2 + $0x158] sm:$0xff]  ;;  %v74_v6 = vld [vmem:[#allocation2 + $0x160] sm:$0xff]  ;;  %v75_v7 = vld [vmem:[#allocation2 + $0x168] sm:$0xff]  ;;  %v358_v60 = vlaneseq }
  0x22   :  { %584 = vmatpush3.bf16.msra.mxu0 %v583_v21  ;;  %v637_v5 = vpack.c.bf16 %v73_v4, %v72_v3  ;;  %v640_v8 = vpack.c.bf16 %v75_v7, %v74_v6  ;;  %v414_v9 = vld [vmem:[#allocation2 + $0x180] ss:$0 sm:$0xff]  ;;  %v76_v14 = vld [vmem:[#allocation2 + $0x170] sm:$0xff]  ;;  %v77_v15 = vld [vmem:[#allocation2 + $0x178] sm:$0xff] }
  0x23   :  { %585 = vmatprep.subr.bf16.mxu0 %v702_v0  ;;  %v643_v16 = vpack.c.bf16 %v77_v15, %v76_v14  ;;  %v415_v17 = vld [vmem:[#allocation2 + $0x181] ss:$0 sm:$0xff]  ;;  %v416_v22 = vld [vmem:[#allocation2 + $0x182] ss:$0 sm:$0xff]  ;;  %v359_v61 = vand.u32 127, %v358_v60 }
  0x24   :  { %608 = vmatpush3.bf16.msra.mxu1 %v607_v30 }
  0x25   :  { %609 = vmatprep.subr.bf16.mxu1 %v702_v0  ;;  %vm360_vm3 = vcmp.eq.s32.totalorder %v359_v61, 0  ;;  %vm367_vm4 = vcmp.eq.s32.totalorder %v359_v61, 1  ;;  %vm374_vm5 = vcmp.eq.s32.totalorder %v359_v61, 2  ;;  %vm380_vm6 = vcmp.eq.s32.totalorder %v359_v61, 3 }
  0x26   :  { %587 = vmatpush3.bf16.msra.mxu0 %v586_v27  ;;  %vm387_vm7 = vcmp.eq.s32.totalorder %v359_v61, 4  ;;  %vm394_vm8 = vcmp.eq.s32.totalorder %v359_v61, 5  ;;  %vm401_vm9 = vcmp.eq.s32.totalorder %v359_v61, 6 }
  0x27   :  { %588 = vmatprep.subr.bf16.mxu0 %v702_v0 }
  0x28   :  { %611 = vmatpush3.bf16.msra.mxu1 %v610_v36  ;;  %v707_v36 = vmov 1  }
  0x29   :  { %612 = vmatprep.subr.bf16.mxu1 %v702_v0  ;;  %658 = vset.pattern.permute.xlu0 %v707_v36 }
  0x2a   :  { %590 = vmatpush3.bf16.msra.mxu0 %v589_v33 }
  0x2b   :  { %591 = vmatprep.subr.bf16.mxu0 %v702_v0 }
  0x2c   :  { %614 = vmatpush3.bf16.msra.mxu1 %v613_v42 }
  0x2d   :  { %615 = vmatprep.subr.bf16.mxu1 %v702_v0 }
  0x2e   :  { %593 = vmatpush3.bf16.msra.mxu0 %v592_v39 }
  0x2f   :  { %594 = vmatprep.subr.bf16.mxu0 %v702_v0 }
  0x30   :  { %617 = vmatpush3.bf16.msra.mxu1 %v616_v46  ;;  %v29_v46 = vld [vmem:[%s790_s2] sm:$0xff] }
  0x31   :  { %618 = vmatprep.subr.bf16.mxu1 %v702_v0 }
  0x32   :  { %596 = vmatpush3.bf16.msra.mxu0 %v595_v45 }
  0x33   :  { %621 = vmatprep.subr.bf16.mxu0 %v702_v0 }
  0x34   :  { %620 = vmatpush3.bf16.msra.mxu1 %v619_v50 }
  0x35   :  { %501 = vmatmul.mubr.f32.vlgmr.msra.gmra.mrb[0].mxu0 %v28_v47 }
  0x36   :  { %570 = vmatprep.mubr.msk.f32.mxu0 %vm703_vm0, %v704_v1  ;;  %623 = vmatpush3.bf16.msra.mxu0 %v622_v54  ;;  %v71_v1 = vld [vmem:[#allocation2 + $0x148] sm:$0xff] }
  0x37   :  { %624 = vmatprep.subr.bf16.mxu0 %v702_v0  ;;  %v634_v2 = vpack.c.bf16 %v71_v1, %v70_v63 }
  0x3a   :  { %626 = vmatpush3.bf16.msra.mxu0 %v625_v56 }
  0x3b   :  { %627 = vmatprep.subr.bf16.mxu0 %v702_v0 }
  0x3e   :  { %629 = vmatpush3.bf16.msra.mxu0 %v628_v59 }
  0x3f   :  { %630 = vmatprep.subr.bf16.mxu0 %v702_v0 }
  0x42   :  { %632 = vmatpush3.bf16.msra.mxu0 %v631_v62 }
  0x43   :  { %633 = vmatprep.subr.bf16.mxu0 %v702_v0 }
  0x46   :  { %635 = vmatpush3.bf16.msra.mxu0 %v634_v2 }
  0x47   :  { %636 = vmatprep.subr.bf16.mxu0 %v702_v0 }
  0x4a   :  { %638 = vmatpush3.bf16.msra.mxu0 %v637_v5 }
  0x4b   :  { %639 = vmatprep.subr.bf16.mxu0 %v702_v0 }
  0x4e   :  { %641 = vmatpush3.bf16.msra.mxu0 %v640_v8 }
  0x4f   :  { %642 = vmatprep.subr.bf16.mxu0 %v702_v0 }
  0x52   :  { %644 = vmatpush3.bf16.msra.mxu0 %v643_v16 }
 0x108   :  { %v151_v10 = vpop.f32.mrb[0].mxu0 }
 0x109   :  { %v152_v11 = vadd.f32 %v414_v9, %v151_v10  ;;  %v502_v12 = vpop.f32.mrb[1].mxu0 }
 0x10b   :  { %v155_v13 = vmax.f32 %v152_v11, 0.0 }
 0x10d   :  { %536 = vmatmul.mubr.f32.vlgmr.msra.gmra.mrb[0].mxu1 %v155_v13 }
 0x1e0   :  { %v226_v18 = vpop.f32.mrb[0].mxu1 }
 0x1e1   :  { %v227_v19 = vadd.f32 %v415_v17, %v226_v18  ;;  %v537_v20 = vpop.f32.mrb[1].mxu1 }
 0x1e3   :  { %v230_v21 = vmax.f32 %v227_v19, 0.0 }
 0x1e5   :  { %571 = vmatmul.mubr.f32.vlgmr.msra.gmra.mrb[2].mxu0 %v230_v21 }
 0x2b8   :  { %v301_v23 = vpop.f32.mrb[2].mxu0 }
 0x2b9   :  { %v302_v24 = vadd.f32 %v416_v22, %v301_v23  ;;  %v572_v0 = vpop.f32.mrb[3].mxu0 }
 0x2bb   :  { %306 = vrot.lane.b32.xlu0 %v302_v24, %s705_s0 }
 0x32d   :  { %v307_v25 = vpop.permute.xlu0 %306 }
 0x32e   :  { %v309_v26 = vmax.f32 %v302_v24, %v307_v25  ;;  %vm351_vm2 = vcmp.ge.f32.partialorder %v302_v24, %v307_v25 }
 0x32f   :  { %v352_v50 = vsel %vm351_vm2, 0.0, %v709_v48 }
 0x330   :  { %314 = vrot.lane.b32.xlu0 %v309_v26, %s706_s27  ;;  %v310_v31 = vsub.f32 %v302_v24, %v309_v26 }
 0x332   :  { %v311_v32 = vmul.f32 1.442695, %v310_v31 }
 0x3a2   :  { %v315_v27 = vpop.permute.xlu0 %314 }
 0x3a3   :  { %v317_v28 = vsub.f32 %v302_v24, %v315_v27 }
 0x3a5   :  { %v318_v29 = vmul.f32 1.442695, %v317_v28 }
 0x3a7   :  { %667 = vpow2.f32 %v318_v29 }
 0x3a8   :  { %669 = vpow2.f32 %v311_v32 }
 0x3b1   :  { %v668_v30 = vpop.eup %667 }
 0x3b2   :  { %321 = vrot.lane.b32.xlu1 %v668_v30, %s705_s0  ;;  %v670_v33 = vpop.eup %669 }
 0x424   :  { %v322_v34 = vpop.permute.xlu1 %321 }
 0x425   :  { %v324_v35 = vadd.f32 %v670_v33, %v322_v34 }
 0x427   :  { %671 = vrcp.f32 %v324_v35 }
 0x428   :  { %673 = vlog2.f32 %v324_v35 }
 0x431   :  { %v672_v38 = vpop.eup %671 }
 0x432   :  { %v674_v39 = vpop.eup %673  ;;  %329 = vrot.lane.b32.xlu1 %v672_v38, %s706_s27  ;;  %v327_v40 = vmul.f32 %v672_v38, %v670_v33 }
 0x433   :  { %v334_v41 = vmul.f32 0.6931472, %v674_v39 }
 0x434   :  { %vm349_vm1 = vcmp.lt.f32.partialorder %v29_v46, %v327_v40 }
 0x435   :  { %337 = vrot.lane.b32.xlu0 %v334_v41, %s706_s27  ;;  %v350_v49 = vsel %vm349_vm1, 0.0, %v709_v48  ;;  %v335_v53 = vsub.f32 %v310_v31, %v334_v41 }
 0x436   :  { %v662_v51 = vpack.i.bf16 %v352_v50, %v350_v49 }
 0x437   :  { %v341_v54 = vmul.f32 %v335_v53, %v327_v40 }
 0x4a4   :  { %v330_v42 = vpop.permute.xlu1 %329 }
 0x4a5   :  { %v332_v44 = vmul.f32 %v668_v30, %v330_v42 }
 0x4a7   :  { %v338_v43 = vpop.permute.xlu0 %337 }
 0x4a8   :  { %v340_v45 = vsub.f32 %v317_v28, %v338_v43 }
 0x4aa   :  { %v342_v47 = vmul.f32 %v340_v45, %v332_v44  ;;  %354 = vrot.lane.b32.xlu0 %v340_v45, %s705_s0 }
 0x4ac   :  { %344 = vrot.lane.b32.xlu1 %v342_v47, %s705_s0 }
 0x4ae   :  { %370 = vperm.xlu0 %658, %v332_v44  }
 0x4b0   :  { %363 = vperm.xlu1 %657, %v327_v40  }
 0x4b2   :  { %661 = vset.pattern.permute.xlu0 %v708_v37 }
 0x4b3   :  { %663 = vperm.xlu0 %661, %v662_v51  }
 0x4b4   :  { %659 = vset.pattern.permute.xlu1 %v710_v52 }
 0x4b5   :  { %376 = vperm.xlu1 %659, %v302_v24  }
 0x4b9   :  { %660 = vset.pattern.permute.xlu1 %v708_v37 }
 0x51c   :  { %v355_v58 = vpop.permute.xlu0 %354 }
 0x51d   :  { %v357_v59 = vsel %vm349_vm1, %v335_v53, %v355_v58 }
 0x51e   :  { %v345_v55 = vpop.permute.xlu1 %344 }
 0x51f   :  { %v347_v56 = vadd.f32 %v345_v55, %v341_v54 }
 0x521   :  { %v348_v57 = vsub.f32 0.0, %v347_v56 }
 0x523   :  { %383 = vperm.xlu1 %660, %v348_v57  }
 0x527   :  { %404 = vperm.xlu1 %660, %v357_v59  }
 0x52d   :  { %v371_v63 = vpop.permute.xlu0 %370 }
 0x52f   :  { %v364_v62 = vpop.permute.xlu1 %363 }
 0x530   :  { %v366_v1 = vsel %vm360_vm3, %v364_v62, 0.0 }
 0x531   :  { %v373_v4 = vsel %vm367_vm4, %v371_v63, %v366_v1 }
 0x532   :  { %v664_v3 = vpop.permute.xlu0 %663 }
 0x533   :  { %v665_v5 = vunpack.i.l.bf16 %v664_v3  ;;  %v666_v8 = vunpack.i.h.bf16 %v664_v3 }
 0x534   :  { %v377_v2 = vpop.permute.xlu1 %376 }
 0x535   :  { %v379_v6 = vsel %vm374_vm5, %v377_v2, %v373_v4 }
 0x5a2   :  { %v384_v7 = vpop.permute.xlu1 %383 }
 0x5a3   :  { %v386_v9 = vsel %vm380_vm6, %v384_v7, %v379_v6 }
 0x5a4   :  { %v393_v10 = vsel %vm387_vm7, %v665_v5, %v386_v9 }
 0x5a5   :  { %v400_v11 = vsel %vm394_vm8, %v666_v8, %v393_v10 }
 0x5a6   :  { %v405_v12 = vpop.permute.xlu1 %404 }
 0x5a7   :  { %v407_v13 = vsel %vm401_vm9, %v405_v12, %v400_v11 }
 0x5a8   :  { %408 = vst [vmem:[%s791_s3] sm:$0xff] %v407_v13 }
 0x5a9   :  { %413 = vsyncpa [#allocation3], 1 }

</bundles_post_ra>
